<compile_context>
chip_gen: v6e
topology: v6e:2x2x1
jax: 0.10.0
libtpu: 0.0.40
codegen_flags: <defaults>
</compile_context>

<pallas_src>
import math

import jax
import jax.numpy as jnp
from jax.experimental import pallas as pl
from jax.experimental.pallas import tpu as pltpu

_LANE = 128
_SUBLANE = 8
_NEG_SLOPE = 0.2


def _round_up(x, m):
    return (x + m - 1) // m * m


def _mapping_kernel(z_ref,
                    w0_ref, b0_ref,
                    w1_ref, b1_ref,
                    w2_ref, b2_ref,
                    w3_ref, b3_ref,
                    out_ref):
    """Fused 4-layer MLP (LeakyReLU(0.2) after the first three) for one batch tile.

    Hidden dims are lane-dense (padded to 128) by the wrapper; accumulation and
    elementwise math stay f32 regardless of the weight dtype.
    """

    def lrelu(x):
        # max(x, 0.2*x) == LeakyReLU(0.2); one VPU mul + one max.
        return jnp.maximum(x, jnp.float32(_NEG_SLOPE) * x)

    def dense(x, w_ref, b_ref):
        w = w_ref[...]
        # Cast lhs to the weight dtype (bf16 by default on all generations —
        # halves/quarters MXU passes and weight DMA bytes); f32 accumulation
        # is preserved via preferred_element_type. Bias add stays f32.
        return jnp.dot(x.astype(w.dtype), w,
                       preferred_element_type=jnp.float32) + b_ref[...]

    h = lrelu(dense(z_ref[...], w0_ref, b0_ref))
    h = lrelu(dense(h, w1_ref, b1_ref))
    h = lrelu(dense(h, w2_ref, b2_ref))
    h = dense(h, w3_ref, b3_ref)
    out_ref[...] = h.astype(out_ref.dtype)


def mapping_network2_forward(z, params, *, style_dim, batch_tile=None,
                             weights_dtype=jnp.bfloat16):
    """Forward pass of MappingNetwork2.

    z: (B, z_dim) float array.
    params: dict with w0..w3 of shape (in_dim, out_dim) (transposed vs PyTorch)
            and b0..b3 of shape (1, out_dim).
    Returns (B, 2, style_dim) float32.
    """
    B, z_dim = z.shape
    mid = params["w0"].shape[1]
    out_dim = params["w3"].shape[1]
    assert out_dim == 2 * style_dim
    assert params["w1"].shape == (mid, mid) and params["w2"].shape == (mid, mid)

    mid_p = _round_up(mid, _LANE)   # lane-dense hidden width (64 -> 128)

    # --- batch tile selection ----------------------------------------------
    if batch_tile is None:
        if B <= 256:
            # Latency regime: single grid step, no pipeline to build.
            batch_tile = _round_up(B, _SUBLANE)
        else:
            # Target ~8 grid steps so the z-in / out-writeback DMA streams get
            # real software-pipeline depth on every generation (and >= 4 steps
            # per TensorCore on v7x). Per-step overhead is only ~0.35 us, so
            # small tiles are cheap. Cap at 2048: keeps per-step intermediates
            # well under v7x's 32 MiB scoped-VMEM default — don't raise this
            # cap without setting pltpu.CompilerParams(vmem_limit_bytes=...).
            batch_tile = min(2048, _round_up(pl.cdiv(B, 8), _SUBLANE))
    assert batch_tile % _SUBLANE == 0, "batch_tile must be a multiple of 8"

    B_p = _round_up(B, batch_tile)

    # --- pad params to lane-dense hidden widths (zeros are inert) ------------
    wdt = jnp.dtype(weights_dtype)

    def pad_w(w, rows, cols):
        w = w.astype(wdt)
        return jnp.pad(w, ((0, rows - w.shape[0]), (0, cols - w.shape[1])))

    def pad_b(b, cols):
        b = b.astype(jnp.float32)
        return jnp.pad(b, ((0, 0), (0, cols - b.shape[1])))

    w0 = pad_w(params["w0"], z_dim, mid_p); b0 = pad_b(params["b0"], mid_p)
    w1 = pad_w(params["w1"], mid_p, mid_p); b1 = pad_b(params["b1"], mid_p)
    w2 = pad_w(params["w2"], mid_p, mid_p); b2 = pad_b(params["b2"], mid_p)
    # Output width is NOT lane-padded: last block dim equals the full array
    # dim (legal BlockSpec), halves output writeback bytes, and removes the
    # post-kernel slice copy over the feature dim.
    w3 = pad_w(params["w3"], mid_p, out_dim); b3 = pad_b(params["b3"], out_dim)

    # Cast z once in the wrapper to the weight dtype (removes layer-0 casts).
    z_p = z.astype(wdt)
    if B_p != B:
        z_p = jnp.pad(z_p, ((0, B_p - B), (0, 0)))

    grid = (B_p // batch_tile,)

    def full_spec(shape):
        # Constant index map -> Pallas skips re-DMA of these blocks across steps.
        return pl.BlockSpec(shape, lambda i: (0,) * len(shape))

    flops = 2 * B_p * (z_dim * mid_p + 2 * mid_p * mid_p + mid_p * out_dim)
    weight_bytes = sum(int(a.size) * a.dtype.itemsize
                       for a in (w0, b0, w1, b1, w2, b2, w3, b3))
    bytes_accessed = (B_p * z_dim * z_p.dtype.itemsize
                      + 4 * B_p * out_dim
                      + weight_bytes)

    out = pl.pallas_call(
        _mapping_kernel,
        out_shape=jax.ShapeDtypeStruct((B_p, out_dim), jnp.float32),
        grid_spec=pltpu.PrefetchScalarGridSpec(
            num_scalar_prefetch=0,
            grid=grid,
            in_specs=[
                pl.BlockSpec((batch_tile, z_dim), lambda i: (i, 0)),
                full_spec(w0.shape), full_spec(b0.shape),
                full_spec(w1.shape), full_spec(b1.shape),
                full_spec(w2.shape), full_spec(b2.shape),
                full_spec(w3.shape), full_spec(b3.shape),
            ],
            out_specs=pl.BlockSpec((batch_tile, out_dim), lambda i: (i, 0)),
        ),
        compiler_params=pltpu.CompilerParams(
            dimension_semantics=("parallel",)),
        cost_estimate=pl.CostEstimate(
            flops=flops, transcendentals=0, bytes_accessed=bytes_accessed),
    )(z_p,
      w0, b0, w1, b1, w2, b2, w3, b3)

    # Only batch padding (if any) needs slicing; reshape is plain-JAX glue.
    if B_p != B:
        out = out[:B]
    return out.reshape(B, 2, style_dim)


def init_params(key, z_dim, mid_hidden_dim, style_dim):
    """Deterministic init mirroring the PyTorch module's __init__ semantics:
       - first three Linear weights: kaiming_normal_(a=0.2, fan_in, leaky_relu)
       - last Linear weight: default PyTorch uniform init, then * 0.25
       - all biases: default PyTorch uniform(+-1/sqrt(fan_in))
       Weights are stored as (in_dim, out_dim)."""
    dims = [(z_dim, mid_hidden_dim),
            (mid_hidden_dim, mid_hidden_dim),
            (mid_hidden_dim, mid_hidden_dim),
            (mid_hidden_dim, 2 * style_dim)]
    keys = jax.random.split(key, 2 * len(dims))
    params = {}
    gain = math.sqrt(2.0 / (1.0 + 0.2 ** 2))  # leaky_relu gain with a=0.2
    for li, (fan_in, fan_out) in enumerate(dims):
        wk, bk = keys[2 * li], keys[2 * li + 1]
        if li < 3:
            std = gain / math.sqrt(fan_in)
            w = std * jax.random.normal(wk, (fan_in, fan_out), dtype=jnp.float32)
        else:
            bound = 1.0 / math.sqrt(fan_in)
            w = jax.random.uniform(wk, (fan_in, fan_out), dtype=jnp.float32,
                                   minval=-bound, maxval=bound)
            w = w * 0.25
        bound = 1.0 / math.sqrt(fan_in)
        b = jax.random.uniform(bk, (1, fan_out), dtype=jnp.float32,
                               minval=-bound, maxval=bound)
        params[f"w{li}"] = w
        params[f"b{li}"] = b
    return params


def _reference_forward(z, params, style_dim):
    """Plain-JAX reference for correctness check."""
    h = z
    for li in range(4):
        h = h @ params[f"w{li}"] + params[f"b{li}"]
        if li < 3:
            h = jnp.where(h > 0, h, 0.2 * h)
    return h.reshape(z.shape[0], 2, style_dim)


if __name__ == "__main__":
    # Small shapes consistent with the module: z_dim=32, mid_hidden=64, style_dim=32.
    B, Z_DIM, MID, STYLE = 16, 32, 64, 32

    key = jax.random.PRNGKey(0)
    k_param, k_z = jax.random.split(key)
    params = init_params(k_param, Z_DIM, MID, STYLE)
    z = jax.random.normal(k_z, (B, Z_DIM), dtype=jnp.float32)

    ref = _reference_forward(z, params, STYLE)

    # f32 weights, default (single-step) tile: tight check vs the reference.
    out_f32 = mapping_network2_forward(z, params, style_dim=STYLE,
                                       weights_dtype=jnp.float32)
    out_f32 = jax.block_until_ready(out_f32)
    assert out_f32.shape == (B, 2, STYLE), out_f32.shape
    assert jnp.allclose(out_f32, ref, atol=1e-5, rtol=1e-5), \
        "mismatch vs reference (f32 weights)"

    # Default path: bf16 weights/activations with f32 accumulation; explicit
    # batch_tile=8 to exercise a multi-step pipelined grid. Looser tolerance
    # (bf16 quantization compounds across the 4 layers, ~1e-2 level).
    out_bf16 = mapping_network2_forward(z, params, style_dim=STYLE, batch_tile=8)
    out_bf16 = jax.block_until_ready(out_bf16)
    assert out_bf16.shape == (B, 2, STYLE), out_bf16.shape
    assert jnp.allclose(out_bf16, ref, atol=1e-1, rtol=1e-1), \
        "mismatch vs reference (bf16 weights)"

    print("KERNEL_OK")
</pallas_src>

<mosaic_0001>
module attributes {stable_mosaic.version = 11 : i64} {
  func.func @_mapping_kernel(%arg0: i32, %arg1: memref<16x32xf32, #tpu.memory_space<vmem>>, %arg2: memref<32x128xf32, #tpu.memory_space<vmem>>, %arg3: memref<1x128xf32, #tpu.memory_space<vmem>>, %arg4: memref<128x128xf32, #tpu.memory_space<vmem>>, %arg5: memref<1x128xf32, #tpu.memory_space<vmem>>, %arg6: memref<128x128xf32, #tpu.memory_space<vmem>>, %arg7: memref<1x128xf32, #tpu.memory_space<vmem>>, %arg8: memref<128x64xf32, #tpu.memory_space<vmem>>, %arg9: memref<1x64xf32, #tpu.memory_space<vmem>>, %arg10: memref<16x64xf32, #tpu.memory_space<vmem>>) attributes {dimension_semantics = [#tpu.dimension_semantics<parallel>], iteration_bounds = array<i64: 1>, scalar_prefetch = 0 : i64, scratch_operands = 0 : i64, tpu.core_type = #tpu.core_type<tc>, window_params = [{transform_indices = @transform_0, window_bounds = array<i64: 16, 32>}, {pipeline_mode = #tpu.pipeline_mode<synchronous>, transform_indices = @transform_1, window_bounds = array<i64: 32, 128>}, {pipeline_mode = #tpu.pipeline_mode<synchronous>, transform_indices = @transform_2, window_bounds = array<i64: 1, 128>}, {pipeline_mode = #tpu.pipeline_mode<synchronous>, transform_indices = @transform_3, window_bounds = array<i64: 128, 128>}, {pipeline_mode = #tpu.pipeline_mode<synchronous>, transform_indices = @transform_4, window_bounds = array<i64: 1, 128>}, {pipeline_mode = #tpu.pipeline_mode<synchronous>, transform_indices = @transform_5, window_bounds = array<i64: 128, 128>}, {pipeline_mode = #tpu.pipeline_mode<synchronous>, transform_indices = @transform_6, window_bounds = array<i64: 1, 128>}, {pipeline_mode = #tpu.pipeline_mode<synchronous>, transform_indices = @transform_7, window_bounds = array<i64: 128, 64>}, {pipeline_mode = #tpu.pipeline_mode<synchronous>, transform_indices = @transform_8, window_bounds = array<i64: 1, 64>}, {transform_indices = @transform_9, window_bounds = array<i64: 16, 64>}]} {
    %c0 = arith.constant 0 : index
    %c0_0 = arith.constant 0 : index
    %0 = vector.load %arg1[%c0, %c0_0] : memref<16x32xf32, #tpu.memory_space<vmem>>, vector<16x32xf32>
    %c0_1 = arith.constant 0 : index
    %c0_2 = arith.constant 0 : index
    %1 = vector.load %arg2[%c0_1, %c0_2] : memref<32x128xf32, #tpu.memory_space<vmem>>, vector<32x128xf32>
    %cst = arith.constant dense<0.000000e+00> : vector<16x128xf32>
    %2 = tpu.matmul %0, %1, %cst {dimension_numbers = #tpu.dot_dimension_numbers<[1], [0], [0], [1], [0, 0, 1, 1], [], []>} : vector<16x32xf32>, vector<32x128xf32>, vector<16x128xf32> -> vector<16x128xf32>
    %c0_3 = arith.constant 0 : index
    %c0_4 = arith.constant 0 : index
    %3 = vector.load %arg3[%c0_3, %c0_4] : memref<1x128xf32, #tpu.memory_space<vmem>>, vector<1x128xf32>
    %4 = vector.broadcast %3 : vector<1x128xf32> to vector<16x128xf32>
    %5 = arith.addf %2, %4 : vector<16x128xf32>
    %cst_5 = arith.constant 2.000000e-01 : f32
    %6 = vector.broadcast %cst_5 : f32 to vector<16x128xf32>
    %7 = arith.mulf %6, %5 : vector<16x128xf32>
    %8 = arith.maximumf %5, %7 : vector<16x128xf32>
    %c0_6 = arith.constant 0 : index
    %c0_7 = arith.constant 0 : index
    %9 = vector.load %arg4[%c0_6, %c0_7] : memref<128x128xf32, #tpu.memory_space<vmem>>, vector<128x128xf32>
    %cst_8 = arith.constant dense<0.000000e+00> : vector<16x128xf32>
    %10 = tpu.matmul %8, %9, %cst_8 {dimension_numbers = #tpu.dot_dimension_numbers<[1], [0], [0], [1], [0, 0, 1, 1], [], []>} : vector<16x128xf32>, vector<128x128xf32>, vector<16x128xf32> -> vector<16x128xf32>
    %c0_9 = arith.constant 0 : index
    %c0_10 = arith.constant 0 : index
    %11 = vector.load %arg5[%c0_9, %c0_10] : memref<1x128xf32, #tpu.memory_space<vmem>>, vector<1x128xf32>
    %12 = vector.broadcast %11 : vector<1x128xf32> to vector<16x128xf32>
    %13 = arith.addf %10, %12 : vector<16x128xf32>
    %cst_11 = arith.constant 2.000000e-01 : f32
    %14 = vector.broadcast %cst_11 : f32 to vector<16x128xf32>
    %15 = arith.mulf %14, %13 : vector<16x128xf32>
    %16 = arith.maximumf %13, %15 : vector<16x128xf32>
    %c0_12 = arith.constant 0 : index
    %c0_13 = arith.constant 0 : index
    %17 = vector.load %arg6[%c0_12, %c0_13] : memref<128x128xf32, #tpu.memory_space<vmem>>, vector<128x128xf32>
    %cst_14 = arith.constant dense<0.000000e+00> : vector<16x128xf32>
    %18 = tpu.matmul %16, %17, %cst_14 {dimension_numbers = #tpu.dot_dimension_numbers<[1], [0], [0], [1], [0, 0, 1, 1], [], []>} : vector<16x128xf32>, vector<128x128xf32>, vector<16x128xf32> -> vector<16x128xf32>
    %c0_15 = arith.constant 0 : index
    %c0_16 = arith.constant 0 : index
    %19 = vector.load %arg7[%c0_15, %c0_16] : memref<1x128xf32, #tpu.memory_space<vmem>>, vector<1x128xf32>
    %20 = vector.broadcast %19 : vector<1x128xf32> to vector<16x128xf32>
    %21 = arith.addf %18, %20 : vector<16x128xf32>
    %cst_17 = arith.constant 2.000000e-01 : f32
    %22 = vector.broadcast %cst_17 : f32 to vector<16x128xf32>
    %23 = arith.mulf %22, %21 : vector<16x128xf32>
    %24 = arith.maximumf %21, %23 : vector<16x128xf32>
    %c0_18 = arith.constant 0 : index
    %c0_19 = arith.constant 0 : index
    %25 = vector.load %arg8[%c0_18, %c0_19] : memref<128x64xf32, #tpu.memory_space<vmem>>, vector<128x64xf32>
    %cst_20 = arith.constant dense<0.000000e+00> : vector<16x64xf32>
    %26 = tpu.matmul %24, %25, %cst_20 {dimension_numbers = #tpu.dot_dimension_numbers<[1], [0], [0], [1], [0, 0, 1, 1], [], []>} : vector<16x128xf32>, vector<128x64xf32>, vector<16x64xf32> -> vector<16x64xf32>
    %c0_21 = arith.constant 0 : index
    %c0_22 = arith.constant 0 : index
    %27 = vector.load %arg9[%c0_21, %c0_22] : memref<1x64xf32, #tpu.memory_space<vmem>>, vector<1x64xf32>
    %28 = vector.broadcast %27 : vector<1x64xf32> to vector<16x64xf32>
    %29 = arith.addf %26, %28 : vector<16x64xf32>
    %c0_23 = arith.constant 0 : index
    %c0_24 = arith.constant 0 : index
    %30 = vector.load %arg10[%c0_23, %c0_24] : memref<16x64xf32, #tpu.memory_space<vmem>>, vector<16x64xf32>
    tpu.vector_store %arg10[%c0_23, %c0_24], %29 {strides = array<i32>} : memref<16x64xf32, #tpu.memory_space<vmem>>, vector<16x64xf32>,
    return
  }
  func.func @transform_0(%arg0: i32) -> (i32, i32) {
    %c0_i32 = arith.constant 0 : i32
    %c0_i32_0 = arith.constant 0 : i32
    return %arg0, %c0_i32 : i32, i32
  }
  func.func @transform_1(%arg0: i32) -> (i32, i32) {
    %c0_i32 = arith.constant 0 : i32
    %c0_i32_0 = arith.constant 0 : i32
    %c0_i32_1 = arith.constant 0 : i32
    return %c0_i32, %c0_i32_0 : i32, i32
  }
  func.func @transform_2(%arg0: i32) -> (i32, i32) {
    %c0_i32 = arith.constant 0 : i32
    %c0_i32_0 = arith.constant 0 : i32
    %c0_i32_1 = arith.constant 0 : i32
    return %c0_i32, %c0_i32_0 : i32, i32
  }
  func.func @transform_3(%arg0: i32) -> (i32, i32) {
    %c0_i32 = arith.constant 0 : i32
    %c0_i32_0 = arith.constant 0 : i32
    %c0_i32_1 = arith.constant 0 : i32
    return %c0_i32, %c0_i32_0 : i32, i32
  }
  func.func @transform_4(%arg0: i32) -> (i32, i32) {
    %c0_i32 = arith.constant 0 : i32
    %c0_i32_0 = arith.constant 0 : i32
    %c0_i32_1 = arith.constant 0 : i32
    return %c0_i32, %c0_i32_0 : i32, i32
  }
  func.func @transform_5(%arg0: i32) -> (i32, i32) {
    %c0_i32 = arith.constant 0 : i32
    %c0_i32_0 = arith.constant 0 : i32
    %c0_i32_1 = arith.constant 0 : i32
    return %c0_i32, %c0_i32_0 : i32, i32
  }
  func.func @transform_6(%arg0: i32) -> (i32, i32) {
    %c0_i32 = arith.constant 0 : i32
    %c0_i32_0 = arith.constant 0 : i32
    %c0_i32_1 = arith.constant 0 : i32
    return %c0_i32, %c0_i32_0 : i32, i32
  }
  func.func @transform_7(%arg0: i32) -> (i32, i32) {
    %c0_i32 = arith.constant 0 : i32
    %c0_i32_0 = arith.constant 0 : i32
    %c0_i32_1 = arith.constant 0 : i32
    return %c0_i32, %c0_i32_0 : i32, i32
  }
  func.func @transform_8(%arg0: i32) -> (i32, i32) {
    %c0_i32 = arith.constant 0 : i32
    %c0_i32_0 = arith.constant 0 : i32
    %c0_i32_1 = arith.constant 0 : i32
    return %c0_i32, %c0_i32_0 : i32, i32
  }
  func.func @transform_9(%arg0: i32) -> (i32, i32) {
    %c0_i32 = arith.constant 0 : i32
    %c0_i32_0 = arith.constant 0 : i32
    return %arg0, %c0_i32 : i32, i32
  }
}

</mosaic_0001>

<bundles_post_ra>
// kernel: tpu_custom_call.1
= control target key start
LH: loop header
LB: loop body
LE: loop exit
PB: predicated region body
PF: predicated region fallthrough
CT: control target
= control target key end

     0   :  { %14 = vsyncpa [#allocation3], 0  ;;  %s892_s0 = inlined_call_operand.vmem [shape: f32[16,32], index: 0, kind: input, shape index: {}]   ;;  %s893_s1 = inlined_call_operand.vmem [shape: f32[32,128], index: 1, kind: input, shape index: {}]   ;;  %s894_s2 = inlined_call_operand.vmem [shape: f32[1,128], index: 2, kind: input, shape index: {}]   ;;  %s895_s3 = inlined_call_operand.vmem [shape: f32[128,128], index: 3, kind: input, shape index: {}]   ;;  %s896_s4 = inlined_call_operand.vmem [shape: f32[1,128], index: 4, kind: input, shape index: {}]   ;;  %s897_s5 = inlined_call_operand.hbm [shape: f32[128,128], index: 5, kind: input, shape index: {}]   ;;  %s898_s6 = inlined_call_operand.vmem [shape: f32[1,128], index: 6, kind: input, shape index: {}]   ;;  %s899_s7 = inlined_call_operand.vmem [shape: f32[128,64], index: 7, kind: input, shape index: {}]   ;;  %s900_s8 = inlined_call_operand.vmem [shape: f32[1,64], index: 8, kind: input, shape index: {}]   ;;  %s901_s9 = inlined_call_operand.hbm [shape: f32[16,64], index: 9, kind: output, shape index: {}]  }
   0x1   :  { %15 = vsyncpa [#allocation4], 0  ;;  %s698_s30 = smov [#allocation2]  }
   0x2   :  { %s31_s10 = sshll.u32 %s698_s30, 4  ;;  %s32_s10 = int_to_ptr.vmem [resolvable:$true] %s31_s10 }
   0x3   :  { %s662_s11 = scalar_lea.vmem %s32_s10, 2048  ;;  %p667_p1 = scmp.lt.s32.totalorder %s32_s10, %s32_s10 }
   0x4   :  { %p663_p0 = scmp.ne.s32.totalorder %s32_s10, %s662_s11  ;;  %p668_p2 = scmp.lt.s32.totalorder %s662_s11, %s662_s11 }
   0x6   :  { %p669_p3 = por %p668_p2, %p667_p1 }
   0x8   :  { %p670_p4 = pnand %p669_p3, %p663_p0 }
   0xa   :  { %673 = shalt.err (!%p670_p4)
}
   0xb   :  { %s699_s12 = smov 128   ;;  %s700_s13 = smov 8  }
   0xc   :  { %37 = dma.hbm_to_vmem [thread:$0]  %s897_s5, 2048, %s32_s10, [#allocation3], %s699_s12, %s699_s12, %s700_s13  }
   0xd   :  { %694 = dma.done.wait [#allocation3], 2048  }
   0xe   :  { %695 = vsyncadd [#allocation3], 4294965248  ;;  %vm60_vm0 = vcmask 261120   ;;  %v52_v0 = vld [vmem:[%s893_s1 + $0x18] sm:$0xff]  ;;  %v51_v1 = vld [vmem:[%s893_s1 + $0x10] sm:$0xff]  ;;  %vm448_vm1 = vcmask 523264  }
   0xf   :  { %534 = vmatprep.subr.mxu0 %v52_v0  ;;  %v47_v2 = vld [vmem:[%s892_s0] sm:$0xff]  ;;  %v50_v3 = vld [vmem:[%s893_s1 + $0x8] sm:$0xff]  ;;  %v161_v4 = vld [vmem:[%s895_s3 + $0x78] sm:$0xff] }
  0x10   :  { %535 = vmatpush3.msra.mxu0 %v52_v0  ;;  %542 = vmatprep.mubr.msk.f32.mxu0 %vm60_vm0, %v47_v2  ;;  %v160_v5 = vld [vmem:[%s895_s3 + $0x70] sm:$0xff]  ;;  %v49_v6 = vld [vmem:[%s893_s1] sm:$0xff]  ;;  %v159_v7 = vld [vmem:[%s895_s3 + $0x68] sm:$0xff] }
  0x11   :  { %536 = vmatprep.subr.mxu0 %v51_v1  ;;  %545 = vmatprep.subr.mxu1 %v161_v4  ;;  %v48_v8 = vld [vmem:[%s892_s0 + $0x8] sm:$0xff]  ;;  %v158_v9 = vld [vmem:[%s895_s3 + $0x60] sm:$0xff]  ;;  %v157_v10 = vld [vmem:[%s895_s3 + $0x58] sm:$0xff] }
  0x12   :  { %537 = vmatpush3.msra.mxu0 %v51_v1  ;;  %546 = vmatpush3.msra.mxu1 %v161_v4  ;;  %v156_v11 = vld [vmem:[%s895_s3 + $0x50] sm:$0xff]  ;;  %v155_v12 = vld [vmem:[%s895_s3 + $0x48] sm:$0xff]  ;;  %v154_v13 = vld [vmem:[%s895_s3 + $0x40] sm:$0xff] }
  0x13   :  { %538 = vmatprep.subr.mxu0 %v50_v3  ;;  %547 = vmatprep.subr.mxu1 %v160_v5  ;;  %v153_v14 = vld [vmem:[%s895_s3 + $0x38] sm:$0xff]  ;;  %v152_v15 = vld [vmem:[%s895_s3 + $0x30] sm:$0xff]  ;;  %v151_v16 = vld [vmem:[%s895_s3 + $0x28] sm:$0xff] }
  0x14   :  { %539 = vmatpush3.msra.mxu0 %v50_v3  ;;  %548 = vmatpush3.msra.mxu1 %v160_v5  ;;  %v150_v17 = vld [vmem:[%s895_s3 + $0x20] sm:$0xff]  ;;  %v149_v18 = vld [vmem:[%s895_s3 + $0x18] sm:$0xff]  ;;  %v148_v19 = vld [vmem:[%s895_s3 + $0x10] sm:$0xff] }
  0x15   :  { %540 = vmatprep.subr.mxu0 %v49_v6  ;;  %549 = vmatprep.subr.mxu1 %v159_v7  ;;  %v147_v20 = vld [vmem:[%s895_s3 + $0x8] sm:$0xff]  ;;  %v146_v21 = vld [vmem:[%s895_s3] sm:$0xff]  ;;  %v263_v22 = vld [vmem:[#allocation2 + $0x78] sm:$0xff] }
  0x16   :  { %541 = vmatpush3.msra.mxu0 %v49_v6  ;;  %550 = vmatpush3.msra.mxu1 %v159_v7  ;;  %v262_v23 = vld [vmem:[#allocation2 + $0x70] sm:$0xff]  ;;  %v261_v24 = vld [vmem:[#allocation2 + $0x68] sm:$0xff]  ;;  %v260_v25 = vld [vmem:[#allocation2 + $0x60] sm:$0xff] }
  0x17   :  { %543 = vmatmul.mubr.msk.f32.vlgmr.msra.gmra.mxu0 %vm60_vm0, %v48_v8  ;;  %551 = vmatprep.subr.mxu1 %v158_v9  ;;  %v259_v26 = vld [vmem:[#allocation2 + $0x58] sm:$0xff]  ;;  %v258_v27 = vld [vmem:[#allocation2 + $0x50] sm:$0xff]  ;;  %v257_v28 = vld [vmem:[#allocation2 + $0x48] sm:$0xff] }
  0x18   :  { %552 = vmatpush3.msra.mxu1 %v158_v9  ;;  %580 = vmatprep.subr.mxu0 %v263_v22  ;;  %v256_v29 = vld [vmem:[#allocation2 + $0x40] sm:$0xff]  ;;  %v255_v30 = vld [vmem:[#allocation2 + $0x38] sm:$0xff]  ;;  %v254_v31 = vld [vmem:[#allocation2 + $0x30] sm:$0xff] }
  0x19   :  { %553 = vmatprep.subr.mxu1 %v157_v10  ;;  %581 = vmatpush3.msra.mxu0 %v263_v22  ;;  %v253_v32 = vld [vmem:[#allocation2 + $0x28] sm:$0xff]  ;;  %v468_v33 = vld [vmem:[%s894_s2] ss:$0 sm:$0xff]  ;;  %v251_v43 = vld [vmem:[#allocation2 + $0x18] sm:$0xff] }
  0x1a   :  { %554 = vmatpush3.msra.mxu1 %v157_v10  ;;  %582 = vmatprep.subr.mxu0 %v262_v23  ;;  %v252_v42 = vld [vmem:[#allocation2 + $0x20] sm:$0xff]  ;;  %v250_v44 = vld [vmem:[#allocation2 + $0x10] sm:$0xff]  ;;  %v249_v45 = vld [vmem:[#allocation2 + $0x8] sm:$0xff] }
  0x1b   :  { %555 = vmatprep.subr.mxu1 %v156_v11  ;;  %583 = vmatpush3.msra.mxu0 %v262_v23  ;;  %v248_v46 = vld [vmem:[#allocation2] sm:$0xff]  ;;  %v365_v47 = vld [vmem:[%s899_s7 + $0x78] sm:$0xff]  ;;  %v364_v48 = vld [vmem:[%s899_s7 + $0x70] sm:$0xff] }
  0x1c   :  { %556 = vmatpush3.msra.mxu1 %v156_v11  ;;  %584 = vmatprep.subr.mxu0 %v261_v24  ;;  %v363_v49 = vld [vmem:[%s899_s7 + $0x68] sm:$0xff]  ;;  %v362_v50 = vld [vmem:[%s899_s7 + $0x60] sm:$0xff]  ;;  %v361_v51 = vld [vmem:[%s899_s7 + $0x58] sm:$0xff] }
  0x1d   :  { %557 = vmatprep.subr.mxu1 %v155_v12  ;;  %585 = vmatpush3.msra.mxu0 %v261_v24  ;;  %v360_v52 = vld [vmem:[%s899_s7 + $0x50] sm:$0xff]  ;;  %v359_v53 = vld [vmem:[%s899_s7 + $0x48] sm:$0xff]  ;;  %v358_v54 = vld [vmem:[%s899_s7 + $0x40] sm:$0xff] }
  0x1e   :  { %558 = vmatpush3.msra.mxu1 %v155_v12  ;;  %586 = vmatprep.subr.mxu0 %v260_v25  ;;  %v357_v55 = vld [vmem:[%s899_s7 + $0x38] sm:$0xff]  ;;  %v356_v56 = vld [vmem:[%s899_s7 + $0x30] sm:$0xff]  ;;  %v355_v57 = vld [vmem:[%s899_s7 + $0x28] sm:$0xff] }
  0x1f   :  { %559 = vmatprep.subr.mxu1 %v154_v13  ;;  %587 = vmatpush3.msra.mxu0 %v260_v25  ;;  %v471_v58 = vld [vmem:[%s896_s4] ss:$0 sm:$0xff]  ;;  %v353_v4 = vld [vmem:[%s899_s7 + $0x18] sm:$0xff]  ;;  %v352_v5 = vld [vmem:[%s899_s7 + $0x10] sm:$0xff] }
  0x20   :  { %560 = vmatpush3.msra.mxu1 %v154_v13  ;;  %588 = vmatprep.subr.mxu0 %v259_v26  ;;  %v354_v3 = vld [vmem:[%s899_s7 + $0x20] sm:$0xff]  ;;  %v351_v6 = vld [vmem:[%s899_s7 + $0x8] sm:$0xff] }
  0x21   :  { %561 = vmatprep.subr.mxu1 %v153_v14  ;;  %589 = vmatpush3.msra.mxu0 %v259_v26  ;;  %v350_v7 = vld [vmem:[%s899_s7] sm:$0xff]  ;;  %s701_s7 = smov [#allocation5]  }
  0x22   :  { %562 = vmatpush3.msra.mxu1 %v153_v14  ;;  %590 = vmatprep.subr.mxu0 %v258_v27  ;;  %v472_v8 = vld [vmem:[%s898_s6] ss:$0 sm:$0xff]  ;;  %s456_s28 = sshll.u32 %s701_s7, 4  ;;  %s457_s28 = int_to_ptr.vmem [resolvable:$true] %s456_s28 }
  0x23   :  { %563 = vmatprep.subr.mxu1 %v152_v15  ;;  %591 = vmatpush3.msra.mxu0 %v258_v27  ;;  %s674_s6 = scalar_lea.vmem %s457_s28, 256  ;;  %p679_p6 = scmp.lt.s32.totalorder %s457_s28, %s457_s28 }
  0x24   :  { %564 = vmatpush3.msra.mxu1 %v152_v15  ;;  %592 = vmatprep.subr.mxu0 %v257_v28  ;;  %p675_p5 = scmp.ne.s32.totalorder %s457_s28, %s674_s6  ;;  %p680_p7 = scmp.lt.s32.totalorder %s674_s6, %s674_s6 }
  0x25   :  { %565 = vmatprep.subr.mxu1 %v151_v16  ;;  %593 = vmatpush3.msra.mxu0 %v257_v28 }
  0x26   :  { %566 = vmatpush3.msra.mxu1 %v151_v16  ;;  %594 = vmatprep.subr.mxu0 %v256_v29  ;;  %p681_p8 = por %p680_p7, %p679_p6 }
  0x27   :  { %567 = vmatprep.subr.mxu1 %v150_v17  ;;  %595 = vmatpush3.msra.mxu0 %v256_v29 }
  0x28   :  { %568 = vmatpush3.msra.mxu1 %v150_v17  ;;  %596 = vmatprep.subr.mxu0 %v255_v30  ;;  %v473_v17 = vld [vmem:[%s900_s8] ss:$0 sm:$0xff]  ;;  %p682_p9 = pnand %p681_p8, %p675_p5 }
  0x29   :  { %569 = vmatprep.subr.mxu1 %v149_v18  ;;  %597 = vmatpush3.msra.mxu0 %v255_v30 }
  0x2a   :  { %570 = vmatpush3.msra.mxu1 %v149_v18  ;;  %598 = vmatprep.subr.mxu0 %v254_v31 }
  0x2b   :  { %571 = vmatprep.subr.mxu1 %v148_v19  ;;  %599 = vmatpush3.msra.mxu0 %v254_v31 }
  0x2c   :  { %572 = vmatpush3.msra.mxu1 %v148_v19  ;;  %600 = vmatprep.subr.mxu0 %v253_v32 }
  0x2d   :  { %573 = vmatprep.subr.mxu1 %v147_v20  ;;  %601 = vmatpush3.msra.mxu0 %v253_v32 }
  0x2e   :  { %574 = vmatpush3.msra.mxu1 %v147_v20  ;;  %602 = vmatprep.subr.mxu0 %v252_v42 }
  0x2f   :  { %575 = vmatprep.subr.mxu1 %v146_v21  ;;  %603 = vmatpush3.msra.mxu0 %v252_v42 }
  0x30   :  { %576 = vmatpush3.msra.mxu1 %v146_v21  ;;  %604 = vmatprep.subr.mxu0 %v251_v43 }
  0x31   :  { %605 = vmatpush3.msra.mxu0 %v251_v43  ;;  %615 = vmatprep.subr.mxu1 %v365_v47 }
  0x32   :  { %606 = vmatprep.subr.mxu0 %v250_v44 }
  0x33   :  { %607 = vmatpush3.msra.mxu0 %v250_v44 }
  0x34   :  { %608 = vmatprep.subr.mxu0 %v249_v45 }
  0x35   :  { %609 = vmatpush3.msra.mxu0 %v249_v45 }
  0x36   :  { %610 = vmatprep.subr.mxu0 %v248_v46 }
  0x37   :  { %611 = vmatpush3.msra.mxu0 %v248_v46 }
  0xd7   :  { %v544_v34 = vpop.f32.mrf.mxu0 }
  0xd8   :  { %v139_v35 = vadd.f32 %v544_v34, %v468_v33 }
  0xd9   :  { %v133_v36 = vpop.f32.mrf.mxu0 }
  0xda   :  { %v134_v37 = vadd.f32 %v468_v33, %v133_v36  ;;  %v143_v38 = vmul.f32 0.2, %v139_v35 }
  0xdc   :  { %v142_v39 = vmul.f32 0.2, %v134_v37  ;;  %v145_v41 = vmax.f32 %v139_v35, %v143_v38 }
  0xde   :  { %v144_v40 = vmax.f32 %v134_v37, %v142_v39 }
  0xe0   :  { %577 = vmatprep.mubr.f32.mxu1 %v144_v40 }
  0xe1   :  { %578 = vmatmul.mubr.f32.vlgmr.msra.gmra.mxu1 %v145_v41 }
  0xe2   :  { %616 = vmatpush3.msra.mxu1 %v365_v47 }
  0xe3   :  { %617 = vmatprep.subr.mxu1 %v364_v48 }
  0xe4   :  { %618 = vmatpush3.msra.mxu1 %v364_v48 }
  0xe5   :  { %619 = vmatprep.subr.mxu1 %v363_v49 }
  0xe6   :  { %620 = vmatpush3.msra.mxu1 %v363_v49 }
  0xe7   :  { %621 = vmatprep.subr.mxu1 %v362_v50 }
  0xe8   :  { %622 = vmatpush3.msra.mxu1 %v362_v50 }
  0xe9   :  { %623 = vmatprep.subr.mxu1 %v361_v51 }
  0xea   :  { %624 = vmatpush3.msra.mxu1 %v361_v51 }
  0xeb   :  { %625 = vmatprep.subr.mxu1 %v360_v52 }
  0xec   :  { %626 = vmatpush3.msra.mxu1 %v360_v52 }
  0xed   :  { %627 = vmatprep.subr.mxu1 %v359_v53 }
  0xee   :  { %628 = vmatpush3.msra.mxu1 %v359_v53 }
  0xef   :  { %629 = vmatprep.subr.mxu1 %v358_v54 }
  0xf0   :  { %630 = vmatpush3.msra.mxu1 %v358_v54 }
  0xf1   :  { %631 = vmatprep.subr.mxu1 %v357_v55 }
  0xf2   :  { %632 = vmatpush3.msra.mxu1 %v357_v55 }
  0xf3   :  { %633 = vmatprep.subr.mxu1 %v356_v56 }
  0xf4   :  { %634 = vmatpush3.msra.mxu1 %v356_v56 }
  0xf5   :  { %635 = vmatprep.subr.mxu1 %v355_v57 }
  0xf6   :  { %636 = vmatpush3.msra.mxu1 %v355_v57 }
  0xf7   :  { %637 = vmatprep.subr.mxu1 %v354_v3 }
  0xf8   :  { %638 = vmatpush3.msra.mxu1 %v354_v3 }
  0xf9   :  { %639 = vmatprep.subr.mxu1 %v353_v4 }
  0xfa   :  { %640 = vmatpush3.msra.mxu1 %v353_v4 }
  0xfb   :  { %641 = vmatprep.subr.mxu1 %v352_v5 }
  0xfc   :  { %642 = vmatpush3.msra.mxu1 %v352_v5 }
  0xfd   :  { %643 = vmatprep.subr.mxu1 %v351_v6 }
  0xfe   :  { %644 = vmatpush3.msra.mxu1 %v351_v6 }
  0xff   :  { %645 = vmatprep.subr.mxu1 %v350_v7 }
 0x100   :  { %646 = vmatpush3.msra.mxu1 %v350_v7 }
 0x1a1   :  { %v579_v59 = vpop.f32.mrf.mxu1 }
 0x1a2   :  { %v241_v60 = vadd.f32 %v579_v59, %v471_v58 }
 0x1a3   :  { %v235_v61 = vpop.f32.mrf.mxu1 }
 0x1a4   :  { %v236_v62 = vadd.f32 %v471_v58, %v235_v61  ;;  %v245_v63 = vmul.f32 0.2, %v241_v60 }
 0x1a6   :  { %v244_v0 = vmul.f32 0.2, %v236_v62  ;;  %v247_v2 = vmax.f32 %v241_v60, %v245_v63 }
 0x1a8   :  { %v246_v1 = vmax.f32 %v236_v62, %v244_v0 }
 0x1aa   :  { %612 = vmatprep.mubr.f32.mxu0 %v246_v1 }
 0x1ab   :  { %613 = vmatmul.mubr.f32.vlgmr.msra.gmra.mxu0 %v247_v2 }
 0x26b   :  { %v614_v9 = vpop.f32.mrf.mxu0 }
 0x26c   :  { %v343_v10 = vadd.f32 %v614_v9, %v472_v8 }
 0x26d   :  { %v337_v11 = vpop.f32.mrf.mxu0 }
 0x26e   :  { %v338_v12 = vadd.f32 %v472_v8, %v337_v11  ;;  %v347_v13 = vmul.f32 0.2, %v343_v10 }
 0x270   :  { %v346_v14 = vmul.f32 0.2, %v338_v12  ;;  %v349_v16 = vmax.f32 %v343_v10, %v347_v13 }
 0x272   :  { %v348_v15 = vmax.f32 %v338_v12, %v346_v14 }
 0x274   :  { %647 = vmatprep.mubr.f32.mxu1 %v348_v15 }
 0x275   :  { %648 = vmatmul.mubr.f32.vlgmr.msra.gmra.mxu1 %v349_v16 }
 0x335   :  { %v649_v18 = vpop.f32.mrf.mxu1 }
 0x336   :  { %v445_v19 = vadd.f32 %v649_v18, %v473_v17 }
 0x337   :  { %v439_v20 = vpop.f32.mrf.mxu1 }
 0x338   :  { %v440_v21 = vadd.f32 %v473_v17, %v439_v20  ;;  %450 = vst.msk [vmem:[#allocation5 + $0x8] sm:$0xff] %vm448_vm1, %v445_v19 }
 0x33a   :  { %449 = vst.msk [vmem:[#allocation5] sm:$0xff] %vm448_vm1, %v440_v21 }
 0x33b   :  { %685 = shalt.err (!%p682_p9)
}
 0x33c   :  { %462 = dma.vmem_to_hbm [thread:$0]  %s457_s28, 256, %s901_s9, [#allocation4], %s699_s12, %s699_s12, %s700_s13  }
 0x33d   :  { %696 = dma.done.wait [#allocation4], 256  }
 0x33e   :  { %697 = vsyncadd [#allocation4], 4294967040 }
 0x33f   :  { %466 = vsyncpa [#allocation3], 1 }
 0x340   :  { %467 = vsyncpa [#allocation4], 1 }

</bundles_post_ra>
